<compile_context>
chip_gen: v7x
topology: tpu7x:2x2x1
jax: 0.10.0
libtpu: 0.0.40
codegen_flags: <defaults>
</compile_context>

<pallas_src>
import functools
import math

import jax
import jax.numpy as jnp
from jax.experimental import pallas as pl
from jax.experimental.pallas import tpu as pltpu


_TM_MAX = 1024   # max rows per tile: 1024 x 512 x 4B = 2 MiB per f32 operand block
_LANES = 512     # lane-dense last dim (multiple of 128)


def _balanced_l1_tile(inp, tgt, *, alpha, gamma, beta):
    """Elementwise Balanced-L1 on one tile; f32 math, constants pre-folded."""
    b = math.exp(gamma / alpha) - 1.0           # Python float (trace-time)
    alpha_over_b = alpha / b
    inv_beta = 1.0 / beta
    c = gamma / b - alpha * beta
    x = jnp.abs(inp.astype(jnp.float32) - tgt.astype(jnp.float32))
    bx = b * x
    inlier = alpha_over_b * (bx + 1.0) * jnp.log(bx * inv_beta + 1.0) - alpha * x
    outlier = gamma * x + c
    return jnp.where(x < beta, inlier, outlier)


def _ew_kernel(inp_ref, tgt_ref, out_ref, *, alpha, gamma, beta):
    loss = _balanced_l1_tile(inp_ref[...], tgt_ref[...],
                             alpha=alpha, gamma=gamma, beta=beta)
    out_ref[...] = loss.astype(out_ref.dtype)


def _sum_kernel(inp_ref, tgt_ref, out_ref, *, alpha, gamma, beta):
    # out_ref is a (1,1) block resident across the whole grid (accumulator).
    @pl.when(pl.program_id(0) == 0)
    def _():
        out_ref[...] = jnp.zeros_like(out_ref)

    loss = _balanced_l1_tile(inp_ref[...], tgt_ref[...],
                             alpha=alpha, gamma=gamma, beta=beta)
    out_ref[...] += jnp.sum(loss)


def _layout(n, tm_max=_TM_MAX, lanes=_LANES):
    """Pick a lane-dense (rows, K) layout and a row-tile size TM.

    Returns (rows, k, tm) with rows % tm == 0, k a multiple of 128, and
    rows * k >= n with padding minimized.
    """
    k = lanes if n >= lanes else 128
    rows_needed = -(-n // k)
    if rows_needed <= tm_max:
        # Single block: exempt from the /8 sublane rule (block == full array).
        return rows_needed, k, rows_needed

    # Multi-tile: TM must be a multiple of 8; pick the candidate that pads
    # the least, preferring larger tiles on ties (fewer grid steps).
    candidates = [t for t in (1024, 512, 256, 128, 64, 32, 16, 8) if t <= tm_max]
    if not candidates:
        candidates = [8]
    best_tm, best_rows = None, None
    for t in candidates:
        padded = -(-rows_needed // t) * t
        if best_rows is None or padded < best_rows:
            best_tm, best_rows = t, padded
    return best_rows, k, best_tm


def balanced_l1_loss(inputs, targets, *, alpha=0.5, gamma=1.5, beta=1.0,
                     reduction="none", _tm_max=_TM_MAX, _lanes=_LANES):
    if reduction not in ("none", "mean", "sum"):
        raise NotImplementedError(reduction)
    if beta <= 0:
        raise ValueError("beta must be strictly positive")
    if sorted(inputs.shape) != sorted(targets.shape):
        raise ValueError("Input and target dimensions do not match!")
    if inputs.dtype != targets.dtype:
        raise ValueError("The inputs and targets must have the same data type!")
    if targets.size == 0:
        # Matches the PyTorch module: returns a scalar zero for empty input.
        return jnp.sum(inputs) * 0

    orig_shape = inputs.shape
    n = inputs.size
    out_dtype = (inputs.dtype if jnp.issubdtype(inputs.dtype, jnp.floating)
                 else jnp.float32)

    rows, k, tm = _layout(n, _tm_max, _lanes)
    pad = rows * k - n

    inp_flat = inputs.reshape(-1)
    tgt_flat = targets.reshape(-1)
    if pad:
        # Pad both with equal values -> x = 0 -> loss = 0 (safe for sum too).
        inp_flat = jnp.pad(inp_flat, (0, pad))
        tgt_flat = jnp.pad(tgt_flat, (0, pad))
    inp2d = inp_flat.reshape(rows, k)
    tgt2d = tgt_flat.reshape(rows, k)

    grid = rows // tm
    consts = dict(alpha=float(alpha), gamma=float(gamma), beta=float(beta))

    if reduction == "none":
        loss2d = pl.pallas_call(
            functools.partial(_ew_kernel, **consts),
            out_shape=jax.ShapeDtypeStruct((rows, k), out_dtype),
            grid=(grid,),
            in_specs=[pl.BlockSpec((tm, k), lambda i: (i, 0)),
                      pl.BlockSpec((tm, k), lambda i: (i, 0))],
            out_specs=pl.BlockSpec((tm, k), lambda i: (i, 0)),
            compiler_params=pltpu.CompilerParams(
                dimension_semantics=("parallel",)),
        )(inp2d, tgt2d)
        return loss2d.reshape(-1)[:n].reshape(orig_shape)

    # 'sum' / 'mean': reduction fused into the kernel -> scalar output only.
    total = pl.pallas_call(
        functools.partial(_sum_kernel, **consts),
        out_shape=jax.ShapeDtypeStruct((1, 1), jnp.float32),
        grid=(grid,),
        in_specs=[pl.BlockSpec((tm, k), lambda i: (i, 0)),
                  pl.BlockSpec((tm, k), lambda i: (i, 0))],
        out_specs=pl.BlockSpec((1, 1), lambda i: (0, 0)),
        compiler_params=pltpu.CompilerParams(
            dimension_semantics=("arbitrary",)),   # accumulator axis
    )(inp2d, tgt2d)[0, 0]

    if reduction == "mean":
        total = total / jnp.float32(n)
    return total.astype(out_dtype)


def _reference(inputs, targets, alpha=0.5, gamma=1.5, beta=1.0):
    x = jnp.abs(inputs.astype(jnp.float32) - targets.astype(jnp.float32))
    b = jnp.exp(gamma / alpha) - 1.0
    return jnp.where(
        x < beta,
        alpha / b * (b * x + 1.0) * jnp.log(b * x / beta + 1.0) - alpha * x,
        gamma * x + gamma / b - alpha * beta)


if __name__ == "__main__":
    key = jax.random.PRNGKey(0)
    k1, k2 = jax.random.split(key)
    # Small shapes consistent with the module's (N, *) contract.
    x = jax.random.normal(k1, (2, 4, 16, 16), dtype=jnp.float32)
    y = jax.random.uniform(k2, (2, 4, 16, 16), dtype=jnp.float32)

    ref = _reference(x, y)

    # reduction='none' (single-tile lane-dense path).
    out = jax.block_until_ready(balanced_l1_loss(x, y, reduction="none"))
    assert out.shape == x.shape and out.dtype == x.dtype
    assert jnp.allclose(out, ref, atol=1e-5, rtol=1e-5)

    # Fused reductions.
    out_sum = jax.block_until_ready(balanced_l1_loss(x, y, reduction="sum"))
    out_mean = jax.block_until_ready(balanced_l1_loss(x, y, reduction="mean"))
    assert jnp.allclose(out_sum, jnp.sum(ref), atol=1e-3, rtol=1e-4)
    assert jnp.allclose(out_mean, jnp.mean(ref), atol=1e-5, rtol=1e-4)

    # Exercise the multi-tile (grid > 1) pipelined path with small test knobs.
    out_t = jax.block_until_ready(
        balanced_l1_loss(x, y, reduction="none", _tm_max=8, _lanes=128))
    out_ts = jax.block_until_ready(
        balanced_l1_loss(x, y, reduction="sum", _tm_max=8, _lanes=128))
    assert jnp.allclose(out_t, ref, atol=1e-5, rtol=1e-5)
    assert jnp.allclose(out_ts, jnp.sum(ref), atol=1e-3, rtol=1e-4)

    print("KERNEL_OK")
</pallas_src>

<mosaic_0001>
module attributes {stable_mosaic.version = 11 : i64} {
  func.func @_ew_kernel(%arg0: i32, %arg1: memref<4x512xf32, #tpu.memory_space<vmem>>, %arg2: memref<4x512xf32, #tpu.memory_space<vmem>>, %arg3: memref<4x512xf32, #tpu.memory_space<vmem>>) attributes {dimension_semantics = [#tpu.dimension_semantics<parallel>], iteration_bounds = array<i64: 1>, scalar_prefetch = 0 : i64, scratch_operands = 0 : i64, tpu.core_type = #tpu.core_type<tc>, window_params = [{transform_indices = @transform_0, window_bounds = array<i64: 4, 512>}, {transform_indices = @transform_1, window_bounds = array<i64: 4, 512>}, {transform_indices = @transform_2, window_bounds = array<i64: 4, 512>}]} {
    %c0 = arith.constant 0 : index
    %c0_0 = arith.constant 0 : index
    %0 = vector.load %arg1[%c0, %c0_0] : memref<4x512xf32, #tpu.memory_space<vmem>>, vector<4x512xf32>
    %c0_1 = arith.constant 0 : index
    %c0_2 = arith.constant 0 : index
    %1 = vector.load %arg2[%c0_1, %c0_2] : memref<4x512xf32, #tpu.memory_space<vmem>>, vector<4x512xf32>
    %2 = arith.subf %0, %1 : vector<4x512xf32>
    %3 = math.absf %2 : vector<4x512xf32>
    %cst = arith.constant 19.085537 : f32
    %4 = vector.broadcast %cst : f32 to vector<4x512xf32>
    %5 = arith.mulf %4, %3 : vector<4x512xf32>
    %cst_3 = arith.constant 1.000000e+00 : f32
    %6 = vector.broadcast %cst_3 : f32 to vector<4x512xf32>
    %7 = arith.addf %5, %6 : vector<4x512xf32>
    %cst_4 = arith.constant 0.0261978488 : f32
    %8 = vector.broadcast %cst_4 : f32 to vector<4x512xf32>
    %9 = arith.mulf %8, %7 : vector<4x512xf32>
    %cst_5 = arith.constant 1.000000e+00 : f32
    %10 = vector.broadcast %cst_5 : f32 to vector<4x512xf32>
    %11 = arith.mulf %5, %10 : vector<4x512xf32>
    %cst_6 = arith.constant 1.000000e+00 : f32
    %12 = vector.broadcast %cst_6 : f32 to vector<4x512xf32>
    %13 = arith.addf %11, %12 : vector<4x512xf32>
    %14 = math.log %13 : vector<4x512xf32>
    %15 = arith.mulf %9, %14 : vector<4x512xf32>
    %cst_7 = arith.constant 5.000000e-01 : f32
    %16 = vector.broadcast %cst_7 : f32 to vector<4x512xf32>
    %17 = arith.mulf %16, %3 : vector<4x512xf32>
    %18 = arith.subf %15, %17 : vector<4x512xf32>
    %cst_8 = arith.constant 1.500000e+00 : f32
    %19 = vector.broadcast %cst_8 : f32 to vector<4x512xf32>
    %20 = arith.mulf %19, %3 : vector<4x512xf32>
    %cst_9 = arith.constant -0.421406448 : f32
    %21 = vector.broadcast %cst_9 : f32 to vector<4x512xf32>
    %22 = arith.addf %20, %21 : vector<4x512xf32>
    %cst_10 = arith.constant 1.000000e+00 : f32
    %23 = vector.broadcast %cst_10 : f32 to vector<4x512xf32>
    %24 = arith.cmpf olt, %3, %23 : vector<4x512xf32>
    %25 = arith.select %24, %18, %22 : vector<4x512xi1>, vector<4x512xf32>
    %c0_11 = arith.constant 0 : index
    %c0_12 = arith.constant 0 : index
    %26 = vector.load %arg3[%c0_11, %c0_12] : memref<4x512xf32, #tpu.memory_space<vmem>>, vector<4x512xf32>
    tpu.vector_store %arg3[%c0_11, %c0_12], %25 {strides = array<i32>} : memref<4x512xf32, #tpu.memory_space<vmem>>, vector<4x512xf32>,
    return
  }
  func.func @transform_0(%arg0: i32) -> (i32, i32) {
    %c0_i32 = arith.constant 0 : i32
    %c0_i32_0 = arith.constant 0 : i32
    return %arg0, %c0_i32 : i32, i32
  }
  func.func @transform_1(%arg0: i32) -> (i32, i32) {
    %c0_i32 = arith.constant 0 : i32
    %c0_i32_0 = arith.constant 0 : i32
    return %arg0, %c0_i32 : i32, i32
  }
  func.func @transform_2(%arg0: i32) -> (i32, i32) {
    %c0_i32 = arith.constant 0 : i32
    %c0_i32_0 = arith.constant 0 : i32
    return %arg0, %c0_i32 : i32, i32
  }
}

</mosaic_0001>

<bundles_post_ra>
// kernel: tpu_custom_call.1
= control target key start
LH: loop header
LB: loop body
LE: loop exit
PB: predicated region body
PF: predicated region fallthrough
CT: control target
= control target key end

     0   :  { %7 = vsyncpa [#allocation3], 0  ;;  %s219_s0 = inlined_call_operand.hbm [shape: f32[4,512], index: 0, kind: input, shape index: {}]   ;;  %s220_s1 = inlined_call_operand.hbm [shape: f32[4,512], index: 1, kind: input, shape index: {}]   ;;  %s221_s2 = inlined_call_operand.hbm [shape: f32[4,512], index: 2, kind: output, shape index: {}]  }
   0x1   :  { %8 = vsyncpa [#allocation6], 0 }
   0x2   :  { %9 = vsyncpa [#allocation4], 0  ;;  %s165_s9 = smov [#allocation2]   ;;  %s166_s11 = smov [#allocation5]  }
   0x3   :  { %s16_s10 = sshll.u32 %s165_s9, 4  ;;  %s26_s12 = sshll.u32 %s166_s11, 4  ;;  %s17_s10 = int_to_ptr.vmem [resolvable:$true] %s16_s10  ;;  %s27_s12 = int_to_ptr.vmem [resolvable:$true] %s26_s12 }
   0x4   :  { %s93_s15 = scalar_lea.hbm %s219_s0, 256 }
   0x5   :  { %p94_p0 = scmp.ne.s32.totalorder %s219_s0, %s93_s15  ;;  %p97_p1 = scmp.lt.u32.totalorder %s93_s15, %s219_s0 }
   0x7   :  { %p99_p2 = pnand %p97_p1, %p94_p0 }
   0x9   :  { %102 = shalt.err (!%p99_p2)
}
   0xa   :  { %s103_s20 = scalar_lea.vmem %s17_s10, 256  ;;  %p108_p4 = scmp.lt.s32.totalorder %s17_s10, %s17_s10 }
   0xb   :  { %p104_p3 = scmp.ne.s32.totalorder %s17_s10, %s103_s20  ;;  %p109_p5 = scmp.lt.s32.totalorder %s103_s20, %s103_s20 }
   0xd   :  { %p110_p6 = por %p109_p5, %p108_p4 }
   0xf   :  { %p111_p7 = pnand %p110_p6, %p104_p3 }
  0x11   :  { %114 = shalt.err (!%p111_p7)
}
  0x12   :  { %19 = dma.hbm_to_vmem [thread:$0]  %s219_s0, 256, %s17_s10, [#allocation3]  }
  0x13   :  { %s115_s25 = scalar_lea.hbm %s220_s1, 256 }
  0x14   :  { %p116_p8 = scmp.ne.s32.totalorder %s220_s1, %s115_s25  ;;  %p119_p9 = scmp.lt.u32.totalorder %s115_s25, %s220_s1 }
  0x16   :  { %p121_p10 = pnand %p119_p9, %p116_p8 }
  0x18   :  { %124 = shalt.err (!%p121_p10)
}
  0x19   :  { %s125_s30 = scalar_lea.vmem %s27_s12, 256  ;;  %p130_p12 = scmp.lt.s32.totalorder %s27_s12, %s27_s12 }
  0x1a   :  { %p126_p11 = scmp.ne.s32.totalorder %s27_s12, %s125_s30  ;;  %p131_p13 = scmp.lt.s32.totalorder %s125_s30, %s125_s30 }
  0x1c   :  { %p132_p0 = por %p131_p13, %p130_p12 }
  0x1e   :  { %p133_p1 = pnand %p132_p0, %p126_p11 }
  0x20   :  { %136 = shalt.err (!%p133_p1)
}
  0x21   :  { %29 = dma.hbm_to_vmem [thread:$0]  %s220_s1, 256, %s27_s12, [#allocation6]  }
  0x22   :  { %159 = dma.done.wait [#allocation3], 256  }
  0x23   :  { %160 = vsyncadd [#allocation3], 4294967040 }
  0x24   :  { %161 = dma.done.wait [#allocation6], 256  }
  0x25   :  { %162 = vsyncadd [#allocation6], 4294967040  ;;  %v36_v0 = vld [vmem:[#allocation2] sm:$0xff]  ;;  %v38_v1 = vld [vmem:[#allocation5] sm:$0xff]  ;;  %s167_s1 = smov [#allocation7]  }
  0x26   :  { %v37_v2 = vld [vmem:[#allocation2 + $0x8] sm:$0xff]  ;;  %v40_v3 = vsub.f32 %v36_v0, %v38_v1  ;;  %v39_v4 = vld [vmem:[#allocation5 + $0x8] sm:$0xff]  ;;  %s76_s4 = sshll.u32 %s167_s1, 4  ;;  %s77_s4 = int_to_ptr.vmem [resolvable:$true] %s76_s4 }
  0x27   :  { %v41_v5 = vsub.f32 %v37_v2, %v39_v4  ;;  %s137_s5 = scalar_lea.vmem %s77_s4, 256  ;;  %p142_p3 = scmp.lt.s32.totalorder %s77_s4, %s77_s4 }
  0x28   :  { %v42_v6 = vand.u32 2147483647, %v40_v3  ;;  %p138_p2 = scmp.ne.s32.totalorder %s77_s4, %s137_s5  ;;  %p143_p4 = scmp.lt.s32.totalorder %s137_s5, %s137_s5 }
  0x29   :  { %v43_v7 = vand.u32 2147483647, %v41_v5 }
  0x2a   :  { %v44_v8 = vmul.f32 19.085537, %v42_v6  ;;  %v60_v13 = vmul.f32 1.5, %v42_v6  ;;  %v56_v19 = vmul.f32 0.5, %v42_v6  ;;  %vm64_vm0 = vcmp.lt.f32.partialorder %v42_v6, 1.0  ;;  %p144_p5 = por %p143_p4, %p142_p3 }
  0x2b   :  { %v45_v9 = vmul.f32 19.085537, %v43_v7  ;;  %v61_v16 = vmul.f32 1.5, %v43_v7  ;;  %v57_v21 = vmul.f32 0.5, %v43_v7  ;;  %vm65_vm1 = vcmp.lt.f32.partialorder %v43_v7, 1.0 }
  0x2c   :  { %v46_v10 = vadd.f32 1.0, %v44_v8  ;;  %v62_v23 = vadd.f32 -0.42140645, %v60_v13  ;;  %p145_p6 = pnand %p144_p5, %p138_p2 }
  0x2d   :  { %v47_v11 = vadd.f32 1.0, %v45_v9  ;;  %v63_v25 = vadd.f32 -0.42140645, %v61_v16 }
  0x2e   :  { %89 = vlog2.f32 %v46_v10  ;;  %v48_v12 = vmul.f32 0.026197849, %v46_v10 }
  0x2f   :  { %91 = vlog2.f32 %v47_v11  ;;  %v49_v15 = vmul.f32 0.026197849, %v47_v11 }
  0x38   :  { %v90_v14 = vpop.eup %89 }
  0x39   :  { %v92_v17 = vpop.eup %91  ;;  %v51_v18 = vmul.f32 0.6931472, %v90_v14 }
  0x3a   :  { %v53_v20 = vmul.f32 0.6931472, %v92_v17 }
  0x3b   :  { %v54_v22 = vmul.f32 %v51_v18, %v48_v12 }
  0x3c   :  { %v55_v24 = vmul.f32 %v53_v20, %v49_v15 }
  0x3d   :  { %v58_v26 = vsub.f32 %v54_v22, %v56_v19 }
  0x3e   :  { %v59_v27 = vsub.f32 %v55_v24, %v57_v21 }
  0x3f   :  { %v66_v28 = vsel %vm64_vm0, %v58_v26, %v62_v23 }
  0x40   :  { %68 = vst [vmem:[#allocation7] sm:$0xff] %v66_v28  ;;  %v67_v29 = vsel %vm65_vm1, %v59_v27, %v63_v25 }
  0x41   :  { %69 = vst [vmem:[#allocation7 + $0x8] sm:$0xff] %v67_v29 }
  0x42   :  { %148 = shalt.err (!%p145_p6)
}
  0x43   :  { %s149_s8 = scalar_lea.hbm %s221_s2, 256 }
  0x44   :  { %p150_p7 = scmp.ne.s32.totalorder %s221_s2, %s149_s8  ;;  %p153_p8 = scmp.lt.u32.totalorder %s149_s8, %s221_s2 }
  0x46   :  { %p155_p9 = pnand %p153_p8, %p150_p7 }
  0x48   :  { %158 = shalt.err (!%p155_p9)
}
  0x49   :  { %79 = dma.vmem_to_hbm [thread:$0]  %s77_s4, 256, %s221_s2, [#allocation4]  }
  0x4a   :  { %163 = dma.done.wait [#allocation4], 256  }
  0x4b   :  { %164 = vsyncadd [#allocation4], 4294967040 }
  0x4c   :  { %83 = vsyncpa [#allocation3], 1 }
  0x4d   :  { %84 = vsyncpa [#allocation6], 1 }
  0x4e   :  { %85 = vsyncpa [#allocation4], 1 }

</bundles_post_ra>
